<compile_context>
chip_gen: v5e
topology: v5e:2x2
jax: 0.10.0
libtpu: 0.0.40
codegen_flags: <defaults>
</compile_context>

<pallas_src>
import numpy as np
import jax
import jax.numpy as jnp
from jax.experimental import pallas as pl
from jax.experimental.pallas import tpu as pltpu


# ----------------------------------------------------------------------------- kernel

def mlp_kernel(x_ref,
               w1_ref, b1_ref,
               w2_ref, b2_ref,
               w3_ref, b3_ref,
               w4_ref, b4_ref,
               w5_ref, b5_ref,
               out_ref):
    cdt = w1_ref.dtype  # MXU operand dtype (f32 or bf16)

    # fc_input (+ folded BN1) -> ReLU     (dropout1 = identity in eval)
    h = jnp.dot(x_ref[...], w1_ref[...],
                preferred_element_type=jnp.float32) + b1_ref[...]
    h = jnp.maximum(h, 0.0)

    # fc_hidden1 (+ folded BN2) -> ReLU   (dropout2 = identity in eval)
    h = jnp.dot(h.astype(cdt), w2_ref[...],
                preferred_element_type=jnp.float32) + b2_ref[...]
    h = jnp.maximum(h, 0.0)

    # fc_hidden2 (+ folded BN3) -> ReLU   (dropout3 = identity in eval)
    h = jnp.dot(h.astype(cdt), w3_ref[...],
                preferred_element_type=jnp.float32) + b3_ref[...]
    h = jnp.maximum(h, 0.0)

    # fc_hidden3 -> ReLU
    h = jnp.dot(h.astype(cdt), w4_ref[...],
                preferred_element_type=jnp.float32) + b4_ref[...]
    h = jnp.maximum(h, 0.0)

    # fc_output: (h4 -> 1) on the VPU + XLU lane reduce (not a 1-wide matmul).
    out = jnp.sum(h * w5_ref[...], axis=-1, keepdims=True) + b5_ref[...]
    out_ref[...] = out.astype(out_ref.dtype)


# ----------------------------------------------------------------------------- params

def _round_up(n, m):
    return ((n + m - 1) // m) * m


def fold_params(params, eps=1e-5, lane=128):
    """Fold BatchNorm (eval-mode, running stats) into the preceding Linear and
    zero-pad hidden feature dims to a multiple of `lane` for lane-dense tiles.
    Call ONCE at parameter-preparation time, outside the serving path."""
    def fold(w, b, g, beta, mean, var):
        scale = g / jnp.sqrt(var + eps)
        shift = beta - mean * scale
        return w * scale[None, :], b * scale + shift

    def pad_mat(w, rows, cols):
        return jnp.pad(w, ((0, rows - w.shape[0]), (0, cols - w.shape[1])))

    def pad_vec(b, n):
        return jnp.pad(b, (0, n - b.shape[0])).reshape(1, n)

    h1 = params["w1"].shape[1]
    h2 = params["w2"].shape[1]
    h3 = params["w3"].shape[1]
    h4 = params["w4"].shape[1]
    h1p, h2p, h3p, h4p = (_round_up(h, lane) for h in (h1, h2, h3, h4))

    f = {}
    w, b = fold(params["w1"], params["b1"],
                params["g1"], params["be1"], params["m1"], params["v1"])
    f["w1"], f["b1"] = pad_mat(w, w.shape[0], h1p), pad_vec(b, h1p)

    w, b = fold(params["w2"], params["b2"],
                params["g2"], params["be2"], params["m2"], params["v2"])
    f["w2"], f["b2"] = pad_mat(w, h1p, h2p), pad_vec(b, h2p)

    w, b = fold(params["w3"], params["b3"],
                params["g3"], params["be3"], params["m3"], params["v3"])
    f["w3"], f["b3"] = pad_mat(w, h2p, h3p), pad_vec(b, h3p)

    f["w4"] = pad_mat(params["w4"], h3p, h4p)
    f["b4"] = pad_vec(params["b4"], h4p)

    f["w5"] = pad_vec(params["w5"].reshape(-1), h4p)   # (1, h4p) row for VPU reduce
    f["b5"] = params["b5"].reshape(1, 1)
    return f


# ----------------------------------------------------------------------------- wrapper

def hr_predictor_forward(x, folded, compute_dtype=jnp.float32, max_tile=1024):
    """x: (B, input_size) f32.  folded: dict from fold_params()."""
    B, F = x.shape

    # Batch tile: multiple of 8 sublanes, capped so VMEM stays well under the
    # scoped limit even on v7x (64 MiB); weights stay resident across steps.
    TB = _round_up(min(max_tile, _round_up(B, 8)), 8)
    Bp = pl.cdiv(B, TB) * TB
    if Bp != B:
        x = jnp.pad(x, ((0, Bp - B), (0, 0)))

    x = x.astype(compute_dtype)
    weight_args = (
        folded["w1"].astype(compute_dtype), folded["b1"],
        folded["w2"].astype(compute_dtype), folded["b2"],
        folded["w3"].astype(compute_dtype), folded["b3"],
        folded["w4"].astype(compute_dtype), folded["b4"],
        folded["w5"], folded["b5"],
    )

    def resident_spec(a):
        # Full-array block with a constant index map -> block index never
        # changes, so Pallas keeps the tile VMEM-resident across grid steps.
        return pl.BlockSpec(a.shape, lambda i: (0, 0))

    out = pl.pallas_call(
        mlp_kernel,
        out_shape=jax.ShapeDtypeStruct((Bp, 1), jnp.float32),
        grid=(Bp // TB,),
        in_specs=[pl.BlockSpec((TB, F), lambda i: (i, 0))]
                 + [resident_spec(a) for a in weight_args],
        out_specs=pl.BlockSpec((TB, 1), lambda i: (i, 0)),
        compiler_params=pltpu.CompilerParams(
            dimension_semantics=("parallel",)),  # shard batch across v7x TCs
    )(x, *weight_args)

    return out[:B]


# ----------------------------------------------------------------------------- reference

def init_params(key, input_size, h1, h2, h3, h4):
    """Deterministic params matching the PyTorch module's shapes.
    Linear weights: xavier_uniform (stored transposed as (in, out)).
    Linear biases: U(-1/sqrt(fan_in), 1/sqrt(fan_in)) (PyTorch default).
    BN: random-but-deterministic gamma/beta/running stats."""
    keys = jax.random.split(key, 32)
    ki = iter(range(32))

    def xavier(k, fan_in, fan_out):
        bound = float(np.sqrt(6.0 / (fan_in + fan_out)))
        return jax.random.uniform(k, (fan_in, fan_out), jnp.float32, -bound, bound)

    def bias(k, fan_in, fan_out):
        bound = 1.0 / float(np.sqrt(fan_in))
        return jax.random.uniform(k, (fan_out,), jnp.float32, -bound, bound)

    p = {}
    dims = [(input_size, h1), (h1, h2), (h2, h3), (h3, h4), (h4, 1)]
    for i, (fi, fo) in enumerate(dims, start=1):
        p[f"w{i}"] = xavier(keys[next(ki)], fi, fo)
        p[f"b{i}"] = bias(keys[next(ki)], fi, fo)

    for i, h in enumerate([h1, h2, h3], start=1):
        p[f"g{i}"] = jax.random.uniform(keys[next(ki)], (h,), jnp.float32, 0.5, 1.5)
        p[f"be{i}"] = 0.1 * jax.random.normal(keys[next(ki)], (h,), jnp.float32)
        p[f"m{i}"] = 0.1 * jax.random.normal(keys[next(ki)], (h,), jnp.float32)
        p[f"v{i}"] = jax.random.uniform(keys[next(ki)], (h,), jnp.float32, 0.5, 1.5)
    return p


def reference_forward(x, params):
    """Pure-JAX reference with identical eval-mode semantics (unfolded BN)."""
    eps = 1e-5

    def bn(y, g, beta, mean, var):
        return g * (y - mean) / jnp.sqrt(var + eps) + beta

    h = jnp.maximum(bn(x @ params["w1"] + params["b1"],
                       params["g1"], params["be1"], params["m1"], params["v1"]), 0.0)
    h = jnp.maximum(bn(h @ params["w2"] + params["b2"],
                       params["g2"], params["be2"], params["m2"], params["v2"]), 0.0)
    h = jnp.maximum(bn(h @ params["w3"] + params["b3"],
                       params["g3"], params["be3"], params["m3"], params["v3"]), 0.0)
    h = jnp.maximum(h @ params["w4"] + params["b4"], 0.0)
    return h @ params["w5"] + params["b5"]


# ----------------------------------------------------------------------------- test

if __name__ == "__main__":
    # Small shapes consistent with the module's forward.
    input_size, h1, h2, h3, h4 = 32, 64, 64, 32, 32

    key = jax.random.PRNGKey(0)
    kx, kx2, kp = jax.random.split(key, 3)
    params = init_params(kp, input_size, h1, h2, h3, h4)

    # BN folding (+ lane padding) happens once, outside the serving path.
    # NOTE: dropout layers are identity in eval mode; train-mode BN batch stats
    # are intentionally not implemented (inference kernel).
    folded = fold_params(params)

    fwd = jax.jit(hr_predictor_forward)

    # Primary check: batch = 8 (multiple of the sublane tile).
    x = jax.random.normal(kx, (8, input_size), jnp.float32)
    out = jax.block_until_ready(fwd(x, folded))
    ref = reference_forward(x, params)
    np.testing.assert_allclose(np.asarray(out), np.asarray(ref),
                               rtol=1e-4, atol=1e-4)
    assert out.shape == (8, 1)

    # Secondary check: uneven batch exercises the batch-padding path.
    x2 = jax.random.normal(kx2, (13, input_size), jnp.float32)
    out2 = jax.block_until_ready(fwd(x2, folded))
    ref2 = reference_forward(x2, params)
    np.testing.assert_allclose(np.asarray(out2), np.asarray(ref2),
                               rtol=1e-4, atol=1e-4)
    assert out2.shape == (13, 1)

    print("KERNEL_OK")
</pallas_src>

<mosaic_0001>
module attributes {stable_mosaic.version = 11 : i64} {
  func.func @mlp_kernel(%arg0: i32, %arg1: memref<8x32xf32, #tpu.memory_space<vmem>>, %arg2: memref<32x128xf32, #tpu.memory_space<vmem>>, %arg3: memref<1x128xf32, #tpu.memory_space<vmem>>, %arg4: memref<128x128xf32, #tpu.memory_space<vmem>>, %arg5: memref<1x128xf32, #tpu.memory_space<vmem>>, %arg6: memref<128x128xf32, #tpu.memory_space<vmem>>, %arg7: memref<1x128xf32, #tpu.memory_space<vmem>>, %arg8: memref<128x128xf32, #tpu.memory_space<vmem>>, %arg9: memref<1x128xf32, #tpu.memory_space<vmem>>, %arg10: memref<1x128xf32, #tpu.memory_space<vmem>>, %arg11: memref<1x1xf32, #tpu.memory_space<vmem>>, %arg12: memref<8x1xf32, #tpu.memory_space<vmem>>) attributes {dimension_semantics = [#tpu.dimension_semantics<parallel>], iteration_bounds = array<i64: 1>, scalar_prefetch = 0 : i64, scratch_operands = 0 : i64, tpu.core_type = #tpu.core_type<tc>, window_params = [{transform_indices = @transform_0, window_bounds = array<i64: 8, 32>}, {pipeline_mode = #tpu.pipeline_mode<synchronous>, transform_indices = @transform_1, window_bounds = array<i64: 32, 128>}, {pipeline_mode = #tpu.pipeline_mode<synchronous>, transform_indices = @transform_2, window_bounds = array<i64: 1, 128>}, {pipeline_mode = #tpu.pipeline_mode<synchronous>, transform_indices = @transform_3, window_bounds = array<i64: 128, 128>}, {pipeline_mode = #tpu.pipeline_mode<synchronous>, transform_indices = @transform_4, window_bounds = array<i64: 1, 128>}, {pipeline_mode = #tpu.pipeline_mode<synchronous>, transform_indices = @transform_5, window_bounds = array<i64: 128, 128>}, {pipeline_mode = #tpu.pipeline_mode<synchronous>, transform_indices = @transform_6, window_bounds = array<i64: 1, 128>}, {pipeline_mode = #tpu.pipeline_mode<synchronous>, transform_indices = @transform_7, window_bounds = array<i64: 128, 128>}, {pipeline_mode = #tpu.pipeline_mode<synchronous>, transform_indices = @transform_8, window_bounds = array<i64: 1, 128>}, {pipeline_mode = #tpu.pipeline_mode<synchronous>, transform_indices = @transform_9, window_bounds = array<i64: 1, 128>}, {pipeline_mode = #tpu.pipeline_mode<synchronous>, transform_indices = @transform_10, window_bounds = array<i64: 1, 1>}, {transform_indices = @transform_11, window_bounds = array<i64: 8, 1>}]} {
    %c0 = arith.constant 0 : index
    %c0_0 = arith.constant 0 : index
    %0 = vector.load %arg1[%c0, %c0_0] : memref<8x32xf32, #tpu.memory_space<vmem>>, vector<8x32xf32>
    %c0_1 = arith.constant 0 : index
    %c0_2 = arith.constant 0 : index
    %1 = vector.load %arg2[%c0_1, %c0_2] : memref<32x128xf32, #tpu.memory_space<vmem>>, vector<32x128xf32>
    %cst = arith.constant dense<0.000000e+00> : vector<8x128xf32>
    %2 = tpu.matmul %0, %1, %cst {dimension_numbers = #tpu.dot_dimension_numbers<[1], [0], [0], [1], [0, 0, 1, 1], [], []>} : vector<8x32xf32>, vector<32x128xf32>, vector<8x128xf32> -> vector<8x128xf32>
    %c0_3 = arith.constant 0 : index
    %c0_4 = arith.constant 0 : index
    %3 = vector.load %arg3[%c0_3, %c0_4] : memref<1x128xf32, #tpu.memory_space<vmem>>, vector<1x128xf32>
    %4 = vector.broadcast %3 : vector<1x128xf32> to vector<8x128xf32>
    %5 = arith.addf %2, %4 : vector<8x128xf32>
    %cst_5 = arith.constant 0.000000e+00 : f32
    %6 = vector.broadcast %cst_5 : f32 to vector<8x128xf32>
    %7 = arith.maximumf %5, %6 : vector<8x128xf32>
    %c0_6 = arith.constant 0 : index
    %c0_7 = arith.constant 0 : index
    %8 = vector.load %arg4[%c0_6, %c0_7] : memref<128x128xf32, #tpu.memory_space<vmem>>, vector<128x128xf32>
    %cst_8 = arith.constant dense<0.000000e+00> : vector<8x128xf32>
    %9 = tpu.matmul %7, %8, %cst_8 {dimension_numbers = #tpu.dot_dimension_numbers<[1], [0], [0], [1], [0, 0, 1, 1], [], []>} : vector<8x128xf32>, vector<128x128xf32>, vector<8x128xf32> -> vector<8x128xf32>
    %c0_9 = arith.constant 0 : index
    %c0_10 = arith.constant 0 : index
    %10 = vector.load %arg5[%c0_9, %c0_10] : memref<1x128xf32, #tpu.memory_space<vmem>>, vector<1x128xf32>
    %11 = vector.broadcast %10 : vector<1x128xf32> to vector<8x128xf32>
    %12 = arith.addf %9, %11 : vector<8x128xf32>
    %cst_11 = arith.constant 0.000000e+00 : f32
    %13 = vector.broadcast %cst_11 : f32 to vector<8x128xf32>
    %14 = arith.maximumf %12, %13 : vector<8x128xf32>
    %c0_12 = arith.constant 0 : index
    %c0_13 = arith.constant 0 : index
    %15 = vector.load %arg6[%c0_12, %c0_13] : memref<128x128xf32, #tpu.memory_space<vmem>>, vector<128x128xf32>
    %cst_14 = arith.constant dense<0.000000e+00> : vector<8x128xf32>
    %16 = tpu.matmul %14, %15, %cst_14 {dimension_numbers = #tpu.dot_dimension_numbers<[1], [0], [0], [1], [0, 0, 1, 1], [], []>} : vector<8x128xf32>, vector<128x128xf32>, vector<8x128xf32> -> vector<8x128xf32>
    %c0_15 = arith.constant 0 : index
    %c0_16 = arith.constant 0 : index
    %17 = vector.load %arg7[%c0_15, %c0_16] : memref<1x128xf32, #tpu.memory_space<vmem>>, vector<1x128xf32>
    %18 = vector.broadcast %17 : vector<1x128xf32> to vector<8x128xf32>
    %19 = arith.addf %16, %18 : vector<8x128xf32>
    %cst_17 = arith.constant 0.000000e+00 : f32
    %20 = vector.broadcast %cst_17 : f32 to vector<8x128xf32>
    %21 = arith.maximumf %19, %20 : vector<8x128xf32>
    %c0_18 = arith.constant 0 : index
    %c0_19 = arith.constant 0 : index
    %22 = vector.load %arg8[%c0_18, %c0_19] : memref<128x128xf32, #tpu.memory_space<vmem>>, vector<128x128xf32>
    %cst_20 = arith.constant dense<0.000000e+00> : vector<8x128xf32>
    %23 = tpu.matmul %21, %22, %cst_20 {dimension_numbers = #tpu.dot_dimension_numbers<[1], [0], [0], [1], [0, 0, 1, 1], [], []>} : vector<8x128xf32>, vector<128x128xf32>, vector<8x128xf32> -> vector<8x128xf32>
    %c0_21 = arith.constant 0 : index
    %c0_22 = arith.constant 0 : index
    %24 = vector.load %arg9[%c0_21, %c0_22] : memref<1x128xf32, #tpu.memory_space<vmem>>, vector<1x128xf32>
    %25 = vector.broadcast %24 : vector<1x128xf32> to vector<8x128xf32>
    %26 = arith.addf %23, %25 : vector<8x128xf32>
    %cst_23 = arith.constant 0.000000e+00 : f32
    %27 = vector.broadcast %cst_23 : f32 to vector<8x128xf32>
    %28 = arith.maximumf %26, %27 : vector<8x128xf32>
    %c0_24 = arith.constant 0 : index
    %c0_25 = arith.constant 0 : index
    %29 = vector.load %arg10[%c0_24, %c0_25] : memref<1x128xf32, #tpu.memory_space<vmem>>, vector<1x128xf32>
    %30 = vector.broadcast %29 : vector<1x128xf32> to vector<8x128xf32>
    %31 = arith.mulf %28, %30 : vector<8x128xf32>
    %cst_26 = arith.constant dense<0.000000e+00> : vector<8xf32>
    %32 = vector.multi_reduction <add>, %31, %cst_26 [1] : vector<8x128xf32> to vector<8xf32>
    %33 = vector.shape_cast %32 : vector<8xf32> to vector<8x1xf32>
    %c0_27 = arith.constant 0 : index
    %c0_28 = arith.constant 0 : index
    %34 = vector.load %arg11[%c0_27, %c0_28] : memref<1x1xf32, #tpu.memory_space<vmem>>, vector<1x1xf32>
    %35 = vector.broadcast %34 : vector<1x1xf32> to vector<8x1xf32>
    %36 = arith.addf %33, %35 : vector<8x1xf32>
    %c0_29 = arith.constant 0 : index
    %c0_30 = arith.constant 0 : index
    %37 = vector.load %arg12[%c0_29, %c0_30] : memref<8x1xf32, #tpu.memory_space<vmem>>, vector<8x1xf32>
    tpu.vector_store %arg12[%c0_29, %c0_30], %36 {strides = array<i32>} : memref<8x1xf32, #tpu.memory_space<vmem>>, vector<8x1xf32>,
    return
  }
  func.func @transform_0(%arg0: i32) -> (i32, i32) {
    %c0_i32 = arith.constant 0 : i32
    %c0_i32_0 = arith.constant 0 : i32
    return %arg0, %c0_i32 : i32, i32
  }
  func.func @transform_1(%arg0: i32) -> (i32, i32) {
    %c0_i32 = arith.constant 0 : i32
    %c0_i32_0 = arith.constant 0 : i32
    %c0_i32_1 = arith.constant 0 : i32
    return %c0_i32, %c0_i32_0 : i32, i32
  }
  func.func @transform_2(%arg0: i32) -> (i32, i32) {
    %c0_i32 = arith.constant 0 : i32
    %c0_i32_0 = arith.constant 0 : i32
    %c0_i32_1 = arith.constant 0 : i32
    return %c0_i32, %c0_i32_0 : i32, i32
  }
  func.func @transform_3(%arg0: i32) -> (i32, i32) {
    %c0_i32 = arith.constant 0 : i32
    %c0_i32_0 = arith.constant 0 : i32
    %c0_i32_1 = arith.constant 0 : i32
    return %c0_i32, %c0_i32_0 : i32, i32
  }
  func.func @transform_4(%arg0: i32) -> (i32, i32) {
    %c0_i32 = arith.constant 0 : i32
    %c0_i32_0 = arith.constant 0 : i32
    %c0_i32_1 = arith.constant 0 : i32
    return %c0_i32, %c0_i32_0 : i32, i32
  }
  func.func @transform_5(%arg0: i32) -> (i32, i32) {
    %c0_i32 = arith.constant 0 : i32
    %c0_i32_0 = arith.constant 0 : i32
    %c0_i32_1 = arith.constant 0 : i32
    return %c0_i32, %c0_i32_0 : i32, i32
  }
  func.func @transform_6(%arg0: i32) -> (i32, i32) {
    %c0_i32 = arith.constant 0 : i32
    %c0_i32_0 = arith.constant 0 : i32
    %c0_i32_1 = arith.constant 0 : i32
    return %c0_i32, %c0_i32_0 : i32, i32
  }
  func.func @transform_7(%arg0: i32) -> (i32, i32) {
    %c0_i32 = arith.constant 0 : i32
    %c0_i32_0 = arith.constant 0 : i32
    %c0_i32_1 = arith.constant 0 : i32
    return %c0_i32, %c0_i32_0 : i32, i32
  }
  func.func @transform_8(%arg0: i32) -> (i32, i32) {
    %c0_i32 = arith.constant 0 : i32
    %c0_i32_0 = arith.constant 0 : i32
    %c0_i32_1 = arith.constant 0 : i32
    return %c0_i32, %c0_i32_0 : i32, i32
  }
  func.func @transform_9(%arg0: i32) -> (i32, i32) {
    %c0_i32 = arith.constant 0 : i32
    %c0_i32_0 = arith.constant 0 : i32
    %c0_i32_1 = arith.constant 0 : i32
    return %c0_i32, %c0_i32_0 : i32, i32
  }
  func.func @transform_10(%arg0: i32) -> (i32, i32) {
    %c0_i32 = arith.constant 0 : i32
    %c0_i32_0 = arith.constant 0 : i32
    %c0_i32_1 = arith.constant 0 : i32
    return %c0_i32, %c0_i32_0 : i32, i32
  }
  func.func @transform_11(%arg0: i32) -> (i32, i32) {
    %c0_i32 = arith.constant 0 : i32
    %c0_i32_0 = arith.constant 0 : i32
    return %arg0, %c0_i32 : i32, i32
  }
}

</mosaic_0001>

<bundles_post_ra>
// kernel: hr_predictor_forward.1
= control target key start
LH: loop header
LB: loop body
LE: loop exit
PB: predicated region body
PF: predicated region fallthrough
CT: control target
= control target key end

     0   :  { %s537_s0 = inlined_call_operand.hbm [shape: f32[8,32], index: 0, kind: input, shape index: {}]   ;;  %s538_s1 = inlined_call_operand.hbm [shape: f32[32,128], index: 1, kind: input, shape index: {}]   ;;  %s539_s2 = inlined_call_operand.vmem [shape: f32[1,128], index: 2, kind: input, shape index: {}]   ;;  %s540_s3 = inlined_call_operand.hbm [shape: f32[128,128], index: 3, kind: input, shape index: {}]   ;;  %s541_s4 = inlined_call_operand.vmem [shape: f32[1,128], index: 4, kind: input, shape index: {}]   ;;  %s542_s5 = inlined_call_operand.hbm [shape: f32[128,128], index: 5, kind: input, shape index: {}]   ;;  %s543_s6 = inlined_call_operand.vmem [shape: f32[1,128], index: 6, kind: input, shape index: {}]   ;;  %s544_s7 = inlined_call_operand.hbm [shape: f32[128,128], index: 7, kind: input, shape index: {}]   ;;  %s545_s8 = inlined_call_operand.vmem [shape: f32[1,128], index: 8, kind: input, shape index: {}]   ;;  %s546_s9 = inlined_call_operand.vmem [shape: f32[1,128], index: 9, kind: input, shape index: {}]   ;;  %s547_s10 = inlined_call_operand.<no memory space> [shape: f32[1,1], index: 10, kind: input, shape index: {}]   ;;  %s548_s11 = inlined_call_operand.vmem [shape: f32[8,1], index: 11, kind: output, shape index: {}]  }
   0x1   :  { %v16_v0 = vstv %s547_s10 }
   0x2   :  { %17 = vst [vmem:[#allocation2] sm:$0x1] %v16_v0 }
   0x3   :  { %18 = vsyncpa [#allocation4], 0 }
   0x4   :  { %19 = vsyncpa [#allocation6], 0  ;;  %s36_s21 = sshll.u32 %s538_s1, 4  ;;  %s37_s21 = int_to_ptr.hbm [resolvable:$true] %s36_s21 }
   0x5   :  { %20 = vsyncpa [#allocation9], 0  ;;  %s434_s22 = smov [#allocation5]   ;;  %s66_s26 = sshll.u32 %s542_s5, 4  ;;  %s67_s26 = int_to_ptr.hbm [resolvable:$true] %s66_s26 }
   0x6   :  { %s38_s23 = sshll.u32 %s434_s22, 4  ;;  %s435_s27 = smov 128   ;;  %s39_s23 = int_to_ptr.vmem [resolvable:$true] %s38_s23 }
   0x7   :  { %s436_s28 = smov 8   ;;  %s437_s10 = smov [#allocation8]  }
   0x8   :  { %44 = dma.hbm_to_vmem [thread:$0]  %s37_s21, 512, %s39_s23, [#allocation6], %s435_s27, %s435_s27, %s436_s28  }
   0x9   :  { %s68_s29 = sshll.u32 %s437_s10, 4  ;;  %s26_s13 = sshll.u32 %s537_s0, 4  ;;  %s69_s29 = int_to_ptr.vmem [resolvable:$true] %s68_s29  ;;  %s27_s13 = int_to_ptr.hbm [resolvable:$true] %s26_s13 }
   0xa   :  { %74 = dma.hbm_to_vmem [thread:$0]  %s67_s26, 2048, %s69_s29, [#allocation9], %s435_s27, %s435_s27, %s436_s28  }
   0xb   :  { %s51_s15 = sshll.u32 %s540_s3, 4  ;;  %s438_s16 = smov [#allocation3]   ;;  %s52_s15 = int_to_ptr.hbm [resolvable:$true] %s51_s15 }
   0xc   :  { %s28_s17 = sshll.u32 %s438_s16, 4  ;;  %s439_s5 = smov [#allocation7]   ;;  %s29_s17 = int_to_ptr.vmem [resolvable:$true] %s28_s17 }
   0xd   :  { %31 = dma.hbm_to_vmem [thread:$0]  %s27_s13, 128, %s29_s17, [#allocation4]  }
   0xe   :  { %s53_s18 = sshll.u32 %s439_s5, 4  ;;  %s81_s21 = sshll.u32 %s544_s7, 4  ;;  %s54_s18 = int_to_ptr.vmem [resolvable:$true] %s53_s18  ;;  %s82_s21 = int_to_ptr.hbm [resolvable:$true] %s81_s21 }
   0xf   :  { %59 = dma.hbm_to_vmem [thread:$0]  %s52_s15, 2048, %s54_s18, [#allocation6], %s435_s27, %s435_s27, %s436_s28  }
  0x10   :  { %s440_s0 = smov [#allocation10]  }
  0x11   :  { %s83_s22 = sshll.u32 %s440_s0, 4  ;;  %s84_s22 = int_to_ptr.vmem [resolvable:$true] %s83_s22 }
  0x12   :  { %89 = dma.hbm_to_vmem [thread:$0]  %s82_s21, 2048, %s84_s22, [#allocation9], %s435_s27, %s435_s27, %s436_s28  }
  0x13   :  { %428 = dma.done.wait [#allocation4], 128  }
  0x14   :  { %429 = vsyncadd [#allocation4], 4294967168 }
  0x15   :  { %430 = dma.done.wait [#allocation6], 2560  }
  0x16   :  { %431 = vsyncadd [#allocation6], 4294964736 }
  0x17   :  { %432 = dma.done.wait [#allocation9], 4096  }
  0x18   :  { %433 = vsyncadd [#allocation9], 4294963200  ;;  %v120_v1 = vld [vmem:[#allocation5 + $0x18] sm:$0xff]  ;;  %v119_v2 = vld [vmem:[#allocation5 + $0x10] sm:$0xff]  ;;  %vm125_vm0 = vcmask 261120   ;;  %vm285_vm1 = vcmask 7168  }
  0x19   :  { %141 = vmatpush.msra.mxu0 %v120_v1  ;;  %v165_v3 = vld [vmem:[#allocation7 + $0x78] sm:$0xff]  ;;  %v118_v4 = vld [vmem:[#allocation5 + $0x8] sm:$0xff]  ;;  %v164_v5 = vld [vmem:[#allocation7 + $0x70] sm:$0xff] }
  0x1a   :  { %170 = vmatpush.msra.mxu1 %v165_v3  ;;  %v163_v6 = vld [vmem:[#allocation7 + $0x68] sm:$0xff]  ;;  %v117_v7 = vld [vmem:[#allocation5] sm:$0xff]  ;;  %v116_v8 = vld [vmem:[#allocation3] sm:$0xff] }
  0x1b   :  { %142 = vmatpush.msra.mxu0 %v119_v2  ;;  %v162_v9 = vld [vmem:[#allocation7 + $0x60] sm:$0xff]  ;;  %v161_v10 = vld [vmem:[#allocation7 + $0x58] sm:$0xff]  ;;  %v160_v11 = vld [vmem:[#allocation7 + $0x50] sm:$0xff] }
  0x1c   :  { %171 = vmatpush.msra.mxu1 %v164_v5  ;;  %v159_v12 = vld [vmem:[#allocation7 + $0x48] sm:$0xff]  ;;  %v158_v13 = vld [vmem:[#allocation7 + $0x40] sm:$0xff]  ;;  %v157_v14 = vld [vmem:[#allocation7 + $0x38] sm:$0xff] }
  0x1d   :  { %143 = vmatpush.msra.mxu0 %v118_v4  ;;  %v156_v15 = vld [vmem:[#allocation7 + $0x30] sm:$0xff]  ;;  %v155_v16 = vld [vmem:[#allocation7 + $0x28] sm:$0xff]  ;;  %v154_v17 = vld [vmem:[#allocation7 + $0x20] sm:$0xff] }
  0x1e   :  { %172 = vmatpush.msra.mxu1 %v163_v6  ;;  %v153_v18 = vld [vmem:[#allocation7 + $0x18] sm:$0xff]  ;;  %v152_v19 = vld [vmem:[#allocation7 + $0x10] sm:$0xff]  ;;  %v151_v20 = vld [vmem:[#allocation7 + $0x8] sm:$0xff] }
  0x1f   :  { %144 = vmatpush.msra.mxu0 %v117_v7  ;;  %v150_v21 = vld [vmem:[#allocation7] sm:$0xff]  ;;  %v206_v22 = vld [vmem:[#allocation8 + $0x78] sm:$0xff]  ;;  %v205_v23 = vld [vmem:[#allocation8 + $0x70] sm:$0xff] }
  0x20   :  { %294 = vmatmul.msk.f32.vlgmr.msra.gmra.mxu0 %vm125_vm0, %v116_v8  ;;  %173 = vmatpush.msra.mxu1 %v162_v9  ;;  %v204_v24 = vld [vmem:[#allocation8 + $0x68] sm:$0xff]  ;;  %v203_v25 = vld [vmem:[#allocation8 + $0x60] sm:$0xff]  ;;  %v202_v26 = vld [vmem:[#allocation8 + $0x58] sm:$0xff] }
  0x21   :  { %211 = vmatpush.msra.mxu2 %v206_v22  ;;  %v201_v27 = vld [vmem:[#allocation8 + $0x50] sm:$0xff]  ;;  %v200_v28 = vld [vmem:[#allocation8 + $0x48] sm:$0xff]  ;;  %v199_v29 = vld [vmem:[#allocation8 + $0x40] sm:$0xff] }
  0x22   :  { %174 = vmatpush.msra.mxu1 %v161_v10  ;;  %v198_v30 = vld [vmem:[#allocation8 + $0x38] sm:$0xff]  ;;  %v197_v31 = vld [vmem:[#allocation8 + $0x30] sm:$0xff]  ;;  %v196_v32 = vld [vmem:[#allocation8 + $0x28] sm:$0xff] }
  0x23   :  { %212 = vmatpush.msra.mxu2 %v205_v23  ;;  %v195_v33 = vld [vmem:[#allocation8 + $0x20] sm:$0xff]  ;;  %v194_v34 = vld [vmem:[#allocation8 + $0x18] sm:$0xff]  ;;  %v302_v35 = vld [vmem:[%s539_s2] ss:$0 sm:$0xff] }
  0x24   :  { %175 = vmatpush.msra.mxu1 %v160_v11  ;;  %v193_v39 = vld [vmem:[#allocation8 + $0x10] sm:$0xff]  ;;  %v192_v40 = vld [vmem:[#allocation8 + $0x8] sm:$0xff]  ;;  %v191_v41 = vld [vmem:[#allocation8] sm:$0xff] }
  0x25   :  { %213 = vmatpush.msra.mxu2 %v204_v24  ;;  %v247_v42 = vld [vmem:[#allocation10 + $0x78] sm:$0xff]  ;;  %v246_v43 = vld [vmem:[#allocation10 + $0x70] sm:$0xff]  ;;  %v245_v44 = vld [vmem:[#allocation10 + $0x68] sm:$0xff] }
  0x26   :  { %176 = vmatpush.msra.mxu1 %v159_v12  ;;  %252 = vmatpush.msra.mxu3 %v247_v42  ;;  %v244_v45 = vld [vmem:[#allocation10 + $0x60] sm:$0xff]  ;;  %v243_v46 = vld [vmem:[#allocation10 + $0x58] sm:$0xff]  ;;  %v242_v47 = vld [vmem:[#allocation10 + $0x50] sm:$0xff] }
  0x27   :  { %214 = vmatpush.msra.mxu2 %v203_v25  ;;  %v241_v48 = vld [vmem:[#allocation10 + $0x48] sm:$0xff]  ;;  %v240_v49 = vld [vmem:[#allocation10 + $0x40] sm:$0xff]  ;;  %v239_v50 = vld [vmem:[#allocation10 + $0x38] sm:$0xff] }
  0x28   :  { %177 = vmatpush.msra.mxu1 %v158_v13  ;;  %253 = vmatpush.msra.mxu3 %v246_v43  ;;  %v238_v51 = vld [vmem:[#allocation10 + $0x30] sm:$0xff]  ;;  %v237_v52 = vld [vmem:[#allocation10 + $0x28] sm:$0xff]  ;;  %v236_v53 = vld [vmem:[#allocation10 + $0x20] sm:$0xff] }
  0x29   :  { %215 = vmatpush.msra.mxu2 %v202_v26  ;;  %v235_v54 = vld [vmem:[#allocation10 + $0x18] sm:$0xff]  ;;  %v303_v55 = vld [vmem:[%s541_s4] ss:$0 sm:$0xff]  ;;  %v233_v60 = vld [vmem:[#allocation10 + $0x8] sm:$0xff] }
  0x2a   :  { %178 = vmatpush.msra.mxu1 %v157_v14  ;;  %254 = vmatpush.msra.mxu3 %v245_v44  ;;  %v234_v59 = vld [vmem:[#allocation10 + $0x10] sm:$0xff]  ;;  %v232_v61 = vld [vmem:[#allocation10] sm:$0xff] }
  0x2b   :  { %216 = vmatpush.msra.mxu2 %v201_v27  ;;  %v304_v62 = vld [vmem:[%s543_s6] ss:$0 sm:$0xff] }
  0x2c   :  { %179 = vmatpush.msra.mxu1 %v156_v15  ;;  %255 = vmatpush.msra.mxu3 %v244_v45  ;;  %v305_v2 = vld [vmem:[%s545_s8] ss:$0 sm:$0xff] }
  0x2d   :  { %217 = vmatpush.msra.mxu2 %v200_v28  ;;  %v306_v5 = vld [vmem:[%s546_s9] ss:$0 sm:$0xff] }
  0x2e   :  { %180 = vmatpush.msra.mxu1 %v155_v16  ;;  %256 = vmatpush.msra.mxu3 %v243_v46  ;;  %v307_v8 = vld [vmem:[#allocation2] ss:$0 sm:$0xff] }
  0x2f   :  { %218 = vmatpush.msra.mxu2 %v199_v29 }
  0x30   :  { %181 = vmatpush.msra.mxu1 %v154_v17  ;;  %257 = vmatpush.msra.mxu3 %v242_v47 }
  0x31   :  { %219 = vmatpush.msra.mxu2 %v198_v30 }
  0x32   :  { %182 = vmatpush.msra.mxu1 %v153_v18  ;;  %258 = vmatpush.msra.mxu3 %v241_v48 }
  0x33   :  { %220 = vmatpush.msra.mxu2 %v197_v31 }
  0x34   :  { %183 = vmatpush.msra.mxu1 %v152_v19  ;;  %259 = vmatpush.msra.mxu3 %v240_v49 }
  0x35   :  { %221 = vmatpush.msra.mxu2 %v196_v32 }
  0x36   :  { %184 = vmatpush.msra.mxu1 %v151_v20  ;;  %260 = vmatpush.msra.mxu3 %v239_v50 }
  0x37   :  { %222 = vmatpush.msra.mxu2 %v195_v33 }
  0x38   :  { %185 = vmatpush.msra.mxu1 %v150_v21  ;;  %261 = vmatpush.msra.mxu3 %v238_v51 }
  0x39   :  { %223 = vmatpush.msra.mxu2 %v194_v34 }
  0x3a   :  { %262 = vmatpush.msra.mxu3 %v237_v52 }
  0x3b   :  { %224 = vmatpush.msra.mxu2 %v193_v39 }
  0x3c   :  { %263 = vmatpush.msra.mxu3 %v236_v53 }
  0x3d   :  { %225 = vmatpush.msra.mxu2 %v192_v40 }
  0x3e   :  { %264 = vmatpush.msra.mxu3 %v235_v54 }
  0x3f   :  { %226 = vmatpush.msra.mxu2 %v191_v41 }
  0x40   :  { %265 = vmatpush.msra.mxu3 %v234_v59 }
  0x42   :  { %266 = vmatpush.msra.mxu3 %v233_v60 }
  0x44   :  { %267 = vmatpush.msra.mxu3 %v232_v61 }
  0x9d   :  { %v146_v36 = vpop.f32.mrf.mxu0 }
  0x9e   :  { %v147_v37 = vadd.f32 %v302_v35, %v146_v36 }
  0xa0   :  { %v149_v38 = vmax.f32 %v147_v37, 0.0 }
  0xa2   :  { %186 = vmatmul.f32.vlgmr.msra.gmra.mxu1 %v149_v38 }
 0x11f   :  { %v187_v56 = vpop.f32.mrf.mxu1 }
 0x120   :  { %v188_v57 = vadd.f32 %v303_v55, %v187_v56 }
 0x122   :  { %v190_v58 = vmax.f32 %v188_v57, 0.0 }
 0x124   :  { %227 = vmatmul.f32.vlgmr.msra.gmra.mxu2 %v190_v58 }
 0x1a7   :  { %v228_v63 = vpop.f32.mrf.mxu2 }
 0x1a8   :  { %v229_v0 = vadd.f32 %v304_v62, %v228_v63 }
 0x1aa   :  { %v231_v1 = vmax.f32 %v229_v0, 0.0 }
 0x1ac   :  { %268 = vmatmul.f32.vlgmr.msra.gmra.mxu3 %v231_v1 }
 0x22f   :  { %v269_v3 = vpop.f32.mrf.mxu3 }
 0x230   :  { %v270_v4 = vadd.f32 %v305_v2, %v269_v3 }
 0x232   :  { %v272_v6 = vmax.f32 %v270_v4, 0.0 }
 0x234   :  { %v277_v7 = vmul.f32 %v306_v5, %v272_v6 }
 0x236   :  { %278 = vadd.xlane.f32.xlu0 %v277_v7 }
 0x2a9   :  { %v279_v9 = vpop.xlane.xlu0 %278 }
 0x2aa   :  { %v284_v10 = vadd.f32 %v307_v8, %v279_v9 }
 0x2ac   :  { %286 = vst.msk [vmem:[%s548_s11] sm:$0xff] %vm285_vm1, %v284_v10 }
 0x2ad   :  { %291 = vsyncpa [#allocation4], 1 }
 0x2ae   :  { %292 = vsyncpa [#allocation6], 1 }
 0x2af   :  { %293 = vsyncpa [#allocation9], 1 }

</bundles_post_ra>
